<compile_context>
chip_gen: v7x
topology: tpu7x:2x2x1
jax: 0.10.0
libtpu: 0.0.40
codegen_flags: <defaults>
</compile_context>

<pallas_src>
import functools

import jax
import jax.numpy as jnp
from jax.experimental import pallas as pl
from jax.experimental.pallas import tpu as pltpu


# ---------------------------------------------------------------------------
# Kernel bodies
# ---------------------------------------------------------------------------

def _store_outputs(o_ref, ll, lh, hl, hh, wavelet_first):
    if wavelet_first:            # o_ref block: (1, 4, cb, th, W2)  (wavelet-major)
        o_ref[0, 0] = ll
        o_ref[0, 1] = lh
        o_ref[0, 2] = hl
        o_ref[0, 3] = hh
    else:                        # o_ref block: (1, cb, 4, th, W2)  (channel-major)
        o_ref[0, :, 0] = ll
        o_ref[0, :, 1] = lh
        o_ref[0, :, 2] = hl
        o_ref[0, :, 3] = hh


def _haar_kernel_mxu(x_ref, mh_ref, o_ref, *, w, w2, fac, wavelet_first, precision):
    """MXU path: column pairing/Haar mix done by a resident +/-1 matrix.

    x_ref : (1, cb, th, 2*w)  row pair 2i / 2i+1 folded into the lane dim.
    mh_ref: (w, 2*w2) f32     constant, VMEM-resident (constant index_map).
    o_ref : (1, 4, cb, th, w2) if wavelet_first else (1, cb, 4, th, w2).
    """
    cb, th = x_ref.shape[1], x_ref.shape[2]
    top = x_ref[0, :, :, pl.ds(0, w)].astype(jnp.float32)   # rows 2i
    bot = x_ref[0, :, :, pl.ds(w, w)].astype(jnp.float32)   # rows 2i+1
    s = (top + bot).reshape(cb * th, w)                     # vertical L
    d = (top - bot).reshape(cb * th, w)                     # vertical H

    mh = mh_ref[...]
    # s @ M = [se+so | se-so] = [LL | LH] / fac ; d @ M = [HL | HH] / fac.
    hs = jnp.dot(s, mh, precision=precision, preferred_element_type=jnp.float32)
    hd = jnp.dot(d, mh, precision=precision, preferred_element_type=jnp.float32)

    odt = o_ref.dtype
    ll = (hs[:, :w2] * fac).astype(odt).reshape(cb, th, w2)
    lh = (hs[:, w2:] * fac).astype(odt).reshape(cb, th, w2)
    hl = (hd[:, :w2] * fac).astype(odt).reshape(cb, th, w2)
    hh = (hd[:, w2:] * fac).astype(odt).reshape(cb, th, w2)
    _store_outputs(o_ref, ll, lh, hl, hh, wavelet_first)


def _haar_kernel_vpu(x_ref, o_ref, *, w, w2, fac, wavelet_first):
    """Exact-f32 VPU path: shift+select unzip network (masks hoisted, no scratch)."""
    top = x_ref[0, :, :, pl.ds(0, w)].astype(jnp.float32)   # rows 2i
    bot = x_ref[0, :, :, pl.ds(w, w)].astype(jnp.float32)   # rows 2i+1
    s = top + bot                                           # (cb, th, w)
    d = top - bot

    lane = jax.lax.broadcasted_iota(jnp.int32, s.shape, s.ndim - 1)
    masks, step = [], 1
    while step < w2:                    # masks computed once, reused 4x
        masks.append((lane & step) != 0)
        step *= 2

    def shift_left(v, k):
        # out[..., i] = v[..., i + k]; the wrapped tail is never consumed.
        return jnp.concatenate([v[..., k:], v[..., :k]], axis=-1)

    def take_even(v):
        # out[..., j] == v[..., 2*j] for j < w2 (log2(w2)-step unzip network).
        k = 1
        for m in masks:
            v = jnp.where(m, shift_left(v, k), v)
            k *= 2
        return v[..., :w2]

    se = take_even(s)                   # x[2i, 2j]   + x[2i+1, 2j]
    so = take_even(shift_left(s, 1))    # x[2i, 2j+1] + x[2i+1, 2j+1]
    de = take_even(d)
    do = take_even(shift_left(d, 1))

    odt = o_ref.dtype
    ll = ((se + so) * fac).astype(odt)
    lh = ((se - so) * fac).astype(odt)
    hl = ((de + do) * fac).astype(odt)
    hh = ((de - do) * fac).astype(odt)
    _store_outputs(o_ref, ll, lh, hl, hh, wavelet_first)


# ---------------------------------------------------------------------------
# Wrapper
# ---------------------------------------------------------------------------

def _haar_col_matrix(W):
    """(W, 2*W2) matrix M with M[:, :W2] = pair sums, M[:, W2:] = pair diffs."""
    W2 = W // 2
    j = jnp.arange(W2)
    m = jnp.zeros((W, 2 * W2), jnp.float32)
    m = m.at[2 * j, j].set(1.0).at[2 * j + 1, j].set(1.0)
    m = m.at[2 * j, W2 + j].set(1.0).at[2 * j + 1, W2 + j].set(-1.0)
    return m


def _pick_blocks(C, H2, W, in_itemsize, out_itemsize, *, target_bytes=3 << 20):
    """Choose (channels per block, output rows per block) for ~target-sized blocks."""
    rq = 16 if out_itemsize < 4 else 8         # keep sub-f32 outputs sublane-dense
    row_bytes = 2 * W * in_itemsize            # input bytes per output row, per chan
    plane_bytes = H2 * row_bytes               # one full input channel plane
    if plane_bytes >= target_bytes:            # tile rows within a single channel
        cb = 1
        th = H2
        max_th = max(rq, (target_bytes // row_bytes) // rq * rq)
        if H2 > max_th:
            for cand in range(max_th, rq - 1, -rq):
                if H2 % cand == 0:
                    th = cand
                    break
    else:                                      # full plane per channel; batch channels
        th = H2
        cb = max(1, min(C, target_bytes // max(plane_bytes, 1)))
        while C % cb:
            cb -= 1
    return cb, th


def haar_downsampling(x, *, rebalance=1.0, order_by_wavelet=False, use_mxu=None):
    """Forward pass (rev=False) of HaarDownsampling for NCHW input."""
    N, C, H, W = x.shape
    assert H % 2 == 0 and W % 2 == 0, "spatial dims must be even"
    H2, W2 = H // 2, W // 2
    fac = 0.5 * rebalance
    in_isz = jnp.dtype(x.dtype).itemsize
    out_isz = in_isz

    if use_mxu is None:
        # MXU deinterleave by default for sub-f32 I/O.  float32 keeps the exact
        # VPU path (matches the f32 conv reference bit-for-bit-ish); the dense
        # (W, W)-shaped mix matrix also stops hiding behind the HBM DMA for very
        # wide images, so cap the auto-path at W <= 1024.
        use_mxu = (x.dtype != jnp.float32) and (W <= 1024)

    cb, th = _pick_blocks(C, H2, W, in_isz, out_isz)
    grid = (N, C // cb, H2 // th)   # all parallel; >=2 steps shard across v7x cores

    # Free, contiguous reshape: rows 2i and 2i+1 of each output row end up side
    # by side in the lane dimension, so the even/odd ROW split inside the kernel
    # is two lane-aligned slices (no per-row loop, no strided/masked accesses).
    xf = x.reshape(N, C, H2, 2 * W)
    in_specs = [pl.BlockSpec((1, cb, th, 2 * W), lambda n, c, h: (n, c, h, 0))]
    operands = [xf]

    if use_mxu:
        mh = _haar_col_matrix(W)
        # Constant index_map -> DMA'd once, stays VMEM-resident for the whole grid.
        in_specs.append(pl.BlockSpec((W, 2 * W2), lambda n, c, h: (0, 0)))
        operands.append(mh)
        precision = (jax.lax.Precision.HIGHEST if x.dtype == jnp.float32
                     else jax.lax.Precision.DEFAULT)
        kernel = functools.partial(_haar_kernel_mxu, w=W, w2=W2, fac=float(fac),
                                   wavelet_first=order_by_wavelet,
                                   precision=precision)
    else:
        kernel = functools.partial(_haar_kernel_vpu, w=W, w2=W2, fac=float(fac),
                                   wavelet_first=order_by_wavelet)

    if order_by_wavelet:
        # Wavelet-major layout; reshaping (N, 4, C, H2, W2) -> (N, 4C, H2, W2)
        # realizes exactly the FrEIA `perm` ordering, with no gather pass.
        out_struct = jax.ShapeDtypeStruct((N, 4, C, H2, W2), x.dtype)
        out_spec = pl.BlockSpec((1, 4, cb, th, W2), lambda n, c, h: (n, 0, c, h, 0))
    else:
        out_struct = jax.ShapeDtypeStruct((N, C, 4, H2, W2), x.dtype)
        out_spec = pl.BlockSpec((1, cb, 4, th, W2), lambda n, c, h: (n, c, 0, h, 0))

    # Footprint-derived VMEM budget (double-buffered I/O blocks + resident matrix
    # + f32 temporaries), clamped to stay friendly on v7x (64 MiB VMEM / core).
    in_blk = cb * th * 2 * W * in_isz
    out_blk = cb * th * 4 * W2 * out_isz
    mh_blk = W * 2 * W2 * 4 if use_mxu else 0
    temps = 6 * cb * th * W * 4
    vmem_limit = int(min(max(2 * (in_blk + out_blk) + mh_blk + temps + (4 << 20),
                             16 << 20), 100 << 20))

    if use_mxu:
        flops = 8 * N * C * H2 * W2 * W            # two (cb*th, W) @ (W, 2*W2) matmuls
    else:
        log2w2 = max(1, (W2 - 1).bit_length())
        flops = (8 + 4 * log2w2) * N * C * H2 * W  # VPU add/sub + unzip selects

    out = pl.pallas_call(
        kernel,
        out_shape=out_struct,
        grid_spec=pltpu.PrefetchScalarGridSpec(
            num_scalar_prefetch=0,
            grid=grid,
            in_specs=in_specs,
            out_specs=out_spec),
        compiler_params=pltpu.CompilerParams(
            dimension_semantics=("parallel", "parallel", "parallel"),
            vmem_limit_bytes=vmem_limit),
        cost_estimate=pl.CostEstimate(
            flops=int(flops),
            transcendentals=0,
            bytes_accessed=int(x.size * (in_isz + out_isz) + mh_blk)),
    )(*operands)
    # Free reshape (merges leading dims only) to the module's output layout.
    return out.reshape(N, 4 * C, H2, W2)


# ---------------------------------------------------------------------------
# Pure-JAX reference: algebraically identical to the grouped stride-2 conv with
# the module's haar_weights, but written with exact elementwise f32 arithmetic.
# ---------------------------------------------------------------------------

def haar_downsampling_ref(x, *, rebalance=1.0, order_by_wavelet=False):
    N, C, H, W = x.shape
    fac = 0.5 * rebalance
    a = x[:, :, 0::2, 0::2].astype(jnp.float32)   # x[2i,   2j]
    b = x[:, :, 0::2, 1::2].astype(jnp.float32)   # x[2i,   2j+1]
    c = x[:, :, 1::2, 0::2].astype(jnp.float32)   # x[2i+1, 2j]
    d = x[:, :, 1::2, 1::2].astype(jnp.float32)   # x[2i+1, 2j+1]
    ll = a + b + c + d                            # [[ 1,  1], [ 1,  1]]
    lh = a - b + c - d                            # [[ 1, -1], [ 1, -1]]
    hl = a + b - c - d                            # [[ 1,  1], [-1, -1]]
    hh = a - b - c + d                            # [[ 1, -1], [-1,  1]]
    out = jnp.stack([ll, lh, hl, hh], axis=2) * fac      # (N, C, 4, H2, W2)
    if order_by_wavelet:
        out = out.transpose(0, 2, 1, 3, 4)                # == out[:, perm] ordering
    return out.reshape(N, 4 * C, H // 2, W // 2)


if __name__ == "__main__":
    key = jax.random.PRNGKey(0)
    N, C, H, W = 2, 4, 16, 16
    x = jax.random.normal(key, (N, C, H, W), dtype=jnp.float32)

    # 1) float32, default ordering (exact VPU path).
    out = jax.block_until_ready(haar_downsampling(x))
    ref = haar_downsampling_ref(x)
    assert out.shape == (N, 4 * C, H // 2, W // 2), out.shape
    assert jnp.allclose(out, ref, atol=1e-5, rtol=1e-5), \
        float(jnp.max(jnp.abs(out - ref)))

    # 2) float32, order_by_wavelet + rebalance (permutation folded into layout).
    out_p = jax.block_until_ready(
        haar_downsampling(x, order_by_wavelet=True, rebalance=0.7))
    ref_p = haar_downsampling_ref(x, order_by_wavelet=True, rebalance=0.7)
    assert jnp.allclose(out_p, ref_p, atol=1e-5, rtol=1e-5), \
        float(jnp.max(jnp.abs(out_p - ref_p)))

    # 3) bfloat16 I/O: auto-selects the MXU deinterleave path.
    xb = x.astype(jnp.bfloat16)
    out_b = jax.block_until_ready(haar_downsampling(xb))
    ref_b = haar_downsampling_ref(xb)              # exact f32 math on bf16 values
    assert out_b.dtype == jnp.bfloat16
    err_b = float(jnp.max(jnp.abs(out_b.astype(jnp.float32) - ref_b)))
    assert jnp.allclose(out_b.astype(jnp.float32), ref_b, atol=5e-2, rtol=5e-2), err_b

    print("KERNEL_OK")
</pallas_src>

<mosaic_0001>
module attributes {stable_mosaic.version = 11 : i64} {
  func.func @_haar_kernel_vpu(%arg0: i32, %arg1: i32, %arg2: i32, %arg3: memref<1x4x8x32xf32, #tpu.memory_space<vmem>>, %arg4: memref<1x4x4x8x8xf32, #tpu.memory_space<vmem>>) attributes {dimension_semantics = [#tpu.dimension_semantics<parallel>, #tpu.dimension_semantics<parallel>, #tpu.dimension_semantics<parallel>], iteration_bounds = array<i64: 2, 1, 1>, scalar_prefetch = 0 : i64, scratch_operands = 0 : i64, tpu.core_type = #tpu.core_type<tc>, window_params = [{transform_indices = @transform_0, window_bounds = array<i64: 1, 4, 8, 32>}, {transform_indices = @transform_1, window_bounds = array<i64: 1, 4, 4, 8, 8>}]} {
    %c0 = arith.constant 0 : index
    %c0_0 = arith.constant 0 : index
    %c0_1 = arith.constant 0 : index
    %c0_2 = arith.constant 0 : index
    %0 = vector.load %arg3[%c0, %c0_0, %c0_1, %c0_2] : memref<1x4x8x32xf32, #tpu.memory_space<vmem>>, vector<1x4x8x16xf32>
    %1 = vector.shape_cast %0 : vector<1x4x8x16xf32> to vector<4x8x16xf32>
    %c0_3 = arith.constant 0 : index
    %c0_4 = arith.constant 0 : index
    %c0_5 = arith.constant 0 : index
    %c16 = arith.constant 16 : index
    %2 = vector.load %arg3[%c0_3, %c0_4, %c0_5, %c16] : memref<1x4x8x32xf32, #tpu.memory_space<vmem>>, vector<1x4x8x16xf32>
    %3 = vector.shape_cast %2 : vector<1x4x8x16xf32> to vector<4x8x16xf32>
    %4 = arith.addf %1, %3 : vector<4x8x16xf32>
    %5 = arith.subf %1, %3 : vector<4x8x16xf32>
    %6 = tpu.iota {dimensions = array<i32: 2>} : vector<4x8x16xi32>
    %c1_i32 = arith.constant 1 : i32
    %7 = vector.broadcast %c1_i32 : i32 to vector<4x8x16xi32>
    %8 = arith.andi %6, %7 : vector<4x8x16xi32>
    %c0_i32 = arith.constant 0 : i32
    %9 = vector.broadcast %c0_i32 : i32 to vector<4x8x16xi32>
    %10 = arith.cmpi ne, %8, %9 : vector<4x8x16xi32>
    %c2_i32 = arith.constant 2 : i32
    %11 = vector.broadcast %c2_i32 : i32 to vector<4x8x16xi32>
    %12 = arith.andi %6, %11 : vector<4x8x16xi32>
    %c0_i32_6 = arith.constant 0 : i32
    %13 = vector.broadcast %c0_i32_6 : i32 to vector<4x8x16xi32>
    %14 = arith.cmpi ne, %12, %13 : vector<4x8x16xi32>
    %c4_i32 = arith.constant 4 : i32
    %15 = vector.broadcast %c4_i32 : i32 to vector<4x8x16xi32>
    %16 = arith.andi %6, %15 : vector<4x8x16xi32>
    %c0_i32_7 = arith.constant 0 : i32
    %17 = vector.broadcast %c0_i32_7 : i32 to vector<4x8x16xi32>
    %18 = arith.cmpi ne, %16, %17 : vector<4x8x16xi32>
    %19 = vector.extract_strided_slice %4 {offsets = [0, 0, 1], sizes = [4, 8, 15], strides = [1, 1, 1]} : vector<4x8x16xf32> to vector<4x8x15xf32>
    %20 = vector.extract_strided_slice %4 {offsets = [0, 0, 0], sizes = [4, 8, 1], strides = [1, 1, 1]} : vector<4x8x16xf32> to vector<4x8x1xf32>
    %21 = tpu.concatenate %19, %20 in 2 : vector<4x8x15xf32>, vector<4x8x1xf32> -> vector<4x8x16xf32>
    %22 = arith.select %10, %21, %4 : vector<4x8x16xi1>, vector<4x8x16xf32>
    %23 = vector.extract_strided_slice %22 {offsets = [0, 0, 2], sizes = [4, 8, 14], strides = [1, 1, 1]} : vector<4x8x16xf32> to vector<4x8x14xf32>
    %24 = vector.extract_strided_slice %22 {offsets = [0, 0, 0], sizes = [4, 8, 2], strides = [1, 1, 1]} : vector<4x8x16xf32> to vector<4x8x2xf32>
    %25 = tpu.concatenate %23, %24 in 2 : vector<4x8x14xf32>, vector<4x8x2xf32> -> vector<4x8x16xf32>
    %26 = arith.select %14, %25, %22 : vector<4x8x16xi1>, vector<4x8x16xf32>
    %27 = vector.extract_strided_slice %26 {offsets = [0, 0, 4], sizes = [4, 8, 12], strides = [1, 1, 1]} : vector<4x8x16xf32> to vector<4x8x12xf32>
    %28 = vector.extract_strided_slice %26 {offsets = [0, 0, 0], sizes = [4, 8, 4], strides = [1, 1, 1]} : vector<4x8x16xf32> to vector<4x8x4xf32>
    %29 = tpu.concatenate %27, %28 in 2 : vector<4x8x12xf32>, vector<4x8x4xf32> -> vector<4x8x16xf32>
    %30 = arith.select %18, %29, %26 : vector<4x8x16xi1>, vector<4x8x16xf32>
    %31 = vector.extract_strided_slice %30 {offsets = [0, 0, 0], sizes = [4, 8, 8], strides = [1, 1, 1]} : vector<4x8x16xf32> to vector<4x8x8xf32>
    %32 = vector.extract_strided_slice %4 {offsets = [0, 0, 1], sizes = [4, 8, 15], strides = [1, 1, 1]} : vector<4x8x16xf32> to vector<4x8x15xf32>
    %33 = vector.extract_strided_slice %4 {offsets = [0, 0, 0], sizes = [4, 8, 1], strides = [1, 1, 1]} : vector<4x8x16xf32> to vector<4x8x1xf32>
    %34 = tpu.concatenate %32, %33 in 2 : vector<4x8x15xf32>, vector<4x8x1xf32> -> vector<4x8x16xf32>
    %35 = vector.extract_strided_slice %34 {offsets = [0, 0, 1], sizes = [4, 8, 15], strides = [1, 1, 1]} : vector<4x8x16xf32> to vector<4x8x15xf32>
    %36 = vector.extract_strided_slice %34 {offsets = [0, 0, 0], sizes = [4, 8, 1], strides = [1, 1, 1]} : vector<4x8x16xf32> to vector<4x8x1xf32>
    %37 = tpu.concatenate %35, %36 in 2 : vector<4x8x15xf32>, vector<4x8x1xf32> -> vector<4x8x16xf32>
    %38 = arith.select %10, %37, %34 : vector<4x8x16xi1>, vector<4x8x16xf32>
    %39 = vector.extract_strided_slice %38 {offsets = [0, 0, 2], sizes = [4, 8, 14], strides = [1, 1, 1]} : vector<4x8x16xf32> to vector<4x8x14xf32>
    %40 = vector.extract_strided_slice %38 {offsets = [0, 0, 0], sizes = [4, 8, 2], strides = [1, 1, 1]} : vector<4x8x16xf32> to vector<4x8x2xf32>
    %41 = tpu.concatenate %39, %40 in 2 : vector<4x8x14xf32>, vector<4x8x2xf32> -> vector<4x8x16xf32>
    %42 = arith.select %14, %41, %38 : vector<4x8x16xi1>, vector<4x8x16xf32>
    %43 = vector.extract_strided_slice %42 {offsets = [0, 0, 4], sizes = [4, 8, 12], strides = [1, 1, 1]} : vector<4x8x16xf32> to vector<4x8x12xf32>
    %44 = vector.extract_strided_slice %42 {offsets = [0, 0, 0], sizes = [4, 8, 4], strides = [1, 1, 1]} : vector<4x8x16xf32> to vector<4x8x4xf32>
    %45 = tpu.concatenate %43, %44 in 2 : vector<4x8x12xf32>, vector<4x8x4xf32> -> vector<4x8x16xf32>
    %46 = arith.select %18, %45, %42 : vector<4x8x16xi1>, vector<4x8x16xf32>
    %47 = vector.extract_strided_slice %46 {offsets = [0, 0, 0], sizes = [4, 8, 8], strides = [1, 1, 1]} : vector<4x8x16xf32> to vector<4x8x8xf32>
    %48 = vector.extract_strided_slice %5 {offsets = [0, 0, 1], sizes = [4, 8, 15], strides = [1, 1, 1]} : vector<4x8x16xf32> to vector<4x8x15xf32>
    %49 = vector.extract_strided_slice %5 {offsets = [0, 0, 0], sizes = [4, 8, 1], strides = [1, 1, 1]} : vector<4x8x16xf32> to vector<4x8x1xf32>
    %50 = tpu.concatenate %48, %49 in 2 : vector<4x8x15xf32>, vector<4x8x1xf32> -> vector<4x8x16xf32>
    %51 = arith.select %10, %50, %5 : vector<4x8x16xi1>, vector<4x8x16xf32>
    %52 = vector.extract_strided_slice %51 {offsets = [0, 0, 2], sizes = [4, 8, 14], strides = [1, 1, 1]} : vector<4x8x16xf32> to vector<4x8x14xf32>
    %53 = vector.extract_strided_slice %51 {offsets = [0, 0, 0], sizes = [4, 8, 2], strides = [1, 1, 1]} : vector<4x8x16xf32> to vector<4x8x2xf32>
    %54 = tpu.concatenate %52, %53 in 2 : vector<4x8x14xf32>, vector<4x8x2xf32> -> vector<4x8x16xf32>
    %55 = arith.select %14, %54, %51 : vector<4x8x16xi1>, vector<4x8x16xf32>
    %56 = vector.extract_strided_slice %55 {offsets = [0, 0, 4], sizes = [4, 8, 12], strides = [1, 1, 1]} : vector<4x8x16xf32> to vector<4x8x12xf32>
    %57 = vector.extract_strided_slice %55 {offsets = [0, 0, 0], sizes = [4, 8, 4], strides = [1, 1, 1]} : vector<4x8x16xf32> to vector<4x8x4xf32>
    %58 = tpu.concatenate %56, %57 in 2 : vector<4x8x12xf32>, vector<4x8x4xf32> -> vector<4x8x16xf32>
    %59 = arith.select %18, %58, %55 : vector<4x8x16xi1>, vector<4x8x16xf32>
    %60 = vector.extract_strided_slice %59 {offsets = [0, 0, 0], sizes = [4, 8, 8], strides = [1, 1, 1]} : vector<4x8x16xf32> to vector<4x8x8xf32>
    %61 = vector.extract_strided_slice %5 {offsets = [0, 0, 1], sizes = [4, 8, 15], strides = [1, 1, 1]} : vector<4x8x16xf32> to vector<4x8x15xf32>
    %62 = vector.extract_strided_slice %5 {offsets = [0, 0, 0], sizes = [4, 8, 1], strides = [1, 1, 1]} : vector<4x8x16xf32> to vector<4x8x1xf32>
    %63 = tpu.concatenate %61, %62 in 2 : vector<4x8x15xf32>, vector<4x8x1xf32> -> vector<4x8x16xf32>
    %64 = vector.extract_strided_slice %63 {offsets = [0, 0, 1], sizes = [4, 8, 15], strides = [1, 1, 1]} : vector<4x8x16xf32> to vector<4x8x15xf32>
    %65 = vector.extract_strided_slice %63 {offsets = [0, 0, 0], sizes = [4, 8, 1], strides = [1, 1, 1]} : vector<4x8x16xf32> to vector<4x8x1xf32>
    %66 = tpu.concatenate %64, %65 in 2 : vector<4x8x15xf32>, vector<4x8x1xf32> -> vector<4x8x16xf32>
    %67 = arith.select %10, %66, %63 : vector<4x8x16xi1>, vector<4x8x16xf32>
    %68 = vector.extract_strided_slice %67 {offsets = [0, 0, 2], sizes = [4, 8, 14], strides = [1, 1, 1]} : vector<4x8x16xf32> to vector<4x8x14xf32>
    %69 = vector.extract_strided_slice %67 {offsets = [0, 0, 0], sizes = [4, 8, 2], strides = [1, 1, 1]} : vector<4x8x16xf32> to vector<4x8x2xf32>
    %70 = tpu.concatenate %68, %69 in 2 : vector<4x8x14xf32>, vector<4x8x2xf32> -> vector<4x8x16xf32>
    %71 = arith.select %14, %70, %67 : vector<4x8x16xi1>, vector<4x8x16xf32>
    %72 = vector.extract_strided_slice %71 {offsets = [0, 0, 4], sizes = [4, 8, 12], strides = [1, 1, 1]} : vector<4x8x16xf32> to vector<4x8x12xf32>
    %73 = vector.extract_strided_slice %71 {offsets = [0, 0, 0], sizes = [4, 8, 4], strides = [1, 1, 1]} : vector<4x8x16xf32> to vector<4x8x4xf32>
    %74 = tpu.concatenate %72, %73 in 2 : vector<4x8x12xf32>, vector<4x8x4xf32> -> vector<4x8x16xf32>
    %75 = arith.select %18, %74, %71 : vector<4x8x16xi1>, vector<4x8x16xf32>
    %76 = vector.extract_strided_slice %75 {offsets = [0, 0, 0], sizes = [4, 8, 8], strides = [1, 1, 1]} : vector<4x8x16xf32> to vector<4x8x8xf32>
    %77 = arith.addf %31, %47 : vector<4x8x8xf32>
    %cst = arith.constant 5.000000e-01 : f32
    %78 = vector.broadcast %cst : f32 to vector<4x8x8xf32>
    %79 = arith.mulf %77, %78 : vector<4x8x8xf32>
    %80 = arith.subf %31, %47 : vector<4x8x8xf32>
    %cst_8 = arith.constant 5.000000e-01 : f32
    %81 = vector.broadcast %cst_8 : f32 to vector<4x8x8xf32>
    %82 = arith.mulf %80, %81 : vector<4x8x8xf32>
    %83 = arith.addf %60, %76 : vector<4x8x8xf32>
    %cst_9 = arith.constant 5.000000e-01 : f32
    %84 = vector.broadcast %cst_9 : f32 to vector<4x8x8xf32>
    %85 = arith.mulf %83, %84 : vector<4x8x8xf32>
    %86 = arith.subf %60, %76 : vector<4x8x8xf32>
    %cst_10 = arith.constant 5.000000e-01 : f32
    %87 = vector.broadcast %cst_10 : f32 to vector<4x8x8xf32>
    %88 = arith.mulf %86, %87 : vector<4x8x8xf32>
    %c0_11 = arith.constant 0 : index
    %c0_12 = arith.constant 0 : index
    %c0_13 = arith.constant 0 : index
    %c0_14 = arith.constant 0 : index
    %c0_15 = arith.constant 0 : index
    %89 = vector.load %arg4[%c0_11, %c0_12, %c0_13, %c0_14, %c0_15] : memref<1x4x4x8x8xf32, #tpu.memory_space<vmem>>, vector<1x4x1x8x8xf32>
    %90 = vector.shape_cast %89 : vector<1x4x1x8x8xf32> to vector<4x8x8xf32>
    %91 = vector.shape_cast %79 : vector<4x8x8xf32> to vector<1x4x1x8x8xf32>
    tpu.vector_store %arg4[%c0_11, %c0_12, %c0_13, %c0_14, %c0_15], %91 {strides = array<i32>} : memref<1x4x4x8x8xf32, #tpu.memory_space<vmem>>, vector<1x4x1x8x8xf32>,
    %c0_16 = arith.constant 0 : index
    %c0_17 = arith.constant 0 : index
    %c1 = arith.constant 1 : index
    %c0_18 = arith.constant 0 : index
    %c0_19 = arith.constant 0 : index
    %92 = vector.load %arg4[%c0_16, %c0_17, %c1, %c0_18, %c0_19] : memref<1x4x4x8x8xf32, #tpu.memory_space<vmem>>, vector<1x4x1x8x8xf32>
    %93 = vector.shape_cast %92 : vector<1x4x1x8x8xf32> to vector<4x8x8xf32>
    %94 = vector.shape_cast %82 : vector<4x8x8xf32> to vector<1x4x1x8x8xf32>
    tpu.vector_store %arg4[%c0_16, %c0_17, %c1, %c0_18, %c0_19], %94 {strides = array<i32>} : memref<1x4x4x8x8xf32, #tpu.memory_space<vmem>>, vector<1x4x1x8x8xf32>,
    %c0_20 = arith.constant 0 : index
    %c0_21 = arith.constant 0 : index
    %c2 = arith.constant 2 : index
    %c0_22 = arith.constant 0 : index
    %c0_23 = arith.constant 0 : index
    %95 = vector.load %arg4[%c0_20, %c0_21, %c2, %c0_22, %c0_23] : memref<1x4x4x8x8xf32, #tpu.memory_space<vmem>>, vector<1x4x1x8x8xf32>
    %96 = vector.shape_cast %95 : vector<1x4x1x8x8xf32> to vector<4x8x8xf32>
    %97 = vector.shape_cast %85 : vector<4x8x8xf32> to vector<1x4x1x8x8xf32>
    tpu.vector_store %arg4[%c0_20, %c0_21, %c2, %c0_22, %c0_23], %97 {strides = array<i32>} : memref<1x4x4x8x8xf32, #tpu.memory_space<vmem>>, vector<1x4x1x8x8xf32>,
    %c0_24 = arith.constant 0 : index
    %c0_25 = arith.constant 0 : index
    %c3 = arith.constant 3 : index
    %c0_26 = arith.constant 0 : index
    %c0_27 = arith.constant 0 : index
    %98 = vector.load %arg4[%c0_24, %c0_25, %c3, %c0_26, %c0_27] : memref<1x4x4x8x8xf32, #tpu.memory_space<vmem>>, vector<1x4x1x8x8xf32>
    %99 = vector.shape_cast %98 : vector<1x4x1x8x8xf32> to vector<4x8x8xf32>
    %100 = vector.shape_cast %88 : vector<4x8x8xf32> to vector<1x4x1x8x8xf32>
    tpu.vector_store %arg4[%c0_24, %c0_25, %c3, %c0_26, %c0_27], %100 {strides = array<i32>} : memref<1x4x4x8x8xf32, #tpu.memory_space<vmem>>, vector<1x4x1x8x8xf32>,
    return
  }
  func.func @transform_0(%arg0: i32, %arg1: i32, %arg2: i32) -> (i32, i32, i32, i32) {
    %c0_i32 = arith.constant 0 : i32
    %c0_i32_0 = arith.constant 0 : i32
    return %arg0, %arg1, %arg2, %c0_i32 : i32, i32, i32, i32
  }
  func.func @transform_1(%arg0: i32, %arg1: i32, %arg2: i32) -> (i32, i32, i32, i32, i32) {
    %c0_i32 = arith.constant 0 : i32
    %c0_i32_0 = arith.constant 0 : i32
    %c0_i32_1 = arith.constant 0 : i32
    return %arg0, %arg1, %c0_i32, %arg2, %c0_i32_0 : i32, i32, i32, i32, i32
  }
}

</mosaic_0001>

<bundles_post_ra>
// kernel: tpu_custom_call.1
= control target key start
LH: loop header
LB: loop body
LE: loop exit
PB: predicated region body
PF: predicated region fallthrough
CT: control target
= control target key end

     0   :  { %6 = vsyncpa [#allocation3], 0  ;;  %s1776_s0 = inlined_call_operand.hbm [shape: f32[2,4,8,32], index: 0, kind: input, shape index: {}]   ;;  %s1777_s1 = inlined_call_operand.hbm [shape: f32[2,4,4,8,8], index: 1, kind: output, shape index: {}]  }
   0x1   :  { %8 = vsyncpa [#allocation3 + $0x1], 0 }
   0x2   :  { %9 = vsyncpa [#allocation4], 0 }
   0x3   :  { %11 = vsyncpa [#allocation4 + $0x1], 0  ;;  %s1039_s6 = smov 0   ;;  %s1041_s7 = smov 0  }
   0x4   :  { %s1043_s8 = smov 0   ;;  %s1045_s9 = smov 0  }
   0x5   :  { %s1047_s10 = smov 0   ;;  %s1049_s11 = smov 0  }
   0x6 LB: > { %s800_s12 = sadd.s32 4294967295, %s1014_s11   ;;  %s801_s13 = sadd.s32 4294967294, %s1014_s11   ;;  %s1014_s11 = sphi %s1049_s11, %s17_s11   ;;  %s1010_s10 = sphi %s1047_s10, %s1798_s10   ;;  %s1006_s9 = sphi %s1045_s9, %s1797_s9   ;;  %s1002_s8 = sphi %s1043_s8, %s1796_s8   ;;  %s998_s7 = sphi %s1041_s7, %s1795_s7   ;;  %s994_s6 = sphi %s1039_s6, %s1794_s6  }
   0x7   : > { %s36_s14 = sadd.s32 1, %s1010_s10  ;;  %s47_s15 = sadd.s32 1, %s1002_s8 }
   0x8   : > { %p38_p0 = scmp.ge.s32.totalorder %s36_s14, 2  ;;  %p54_p1 = scmp.ne.s32.totalorder %s1002_s8, %s998_s7 }
   0x9   : > { %p55_p2 = scmp.eq.s32.totalorder %s1014_s11, 0  ;;  %p60_p3 = scmp.ne.s32.totalorder %s998_s7, %s994_s6 }
   0xa   : > { %s1800_s14 = smov (%p38_p0, %s36_s14), 0  ;;  %p61_p5 = scmp.eq.s32.totalorder %s800_s12, 0 }
   0xb   : > { %p1080_p4 = por %p55_p2, %p54_p1  ;;  %s40_s17 = ssub.s32 %s1010_s10, %s1800_s14 }
   0xc   : > { %p88_p6 = scmp.eq.s32.totalorder %s800_s12, 1  ;;  %p45_p7 = scmp.eq.s32.totalorder %s40_s17, 0 }
   0xd   : > { %p1086_p8 = por %p61_p5, %p60_p3  ;;  %p94_p10 = scmp.eq.s32.totalorder %s801_s13, 1 }
   0xe   : > { %p1090_p9 = por %p88_p6, %p54_p1  ;;  %p841_p13 = scmp.lt.s32.totalorder %s1014_s11, 2 }
   0xf   : > { %s1095_s20 = scalar_select %p45_p7, %s1002_s8, %s47_s15  }
  0x10   : > { %s1781_s19 = scalar_select %p1090_p9, 1, 0 }
  0x11   : > { %p1097_p11 = por %p94_p10, %p60_p3  ;;  %s114_s22 = sand.u32 1, %s1002_s8  }
  0x12   : > { %s804_s23 = sshll.u32 %s114_s22, 5  ;;  %s827_s24 = sshll.u32 %s1010_s10, 9 }
  0x13   : > { %s1782_s21 = scalar_select %p1097_p11, 1, 0 }
  0x14   : > { %s1108_s27 = scalar_lea.hbm %s1776_s0, %s827_s24  ;;  %s118_s28 = scalar_lea.vmem [#allocation2], %s804_s23 }
  0x15   : > { %s128_s29 = sshll.u32 %s118_s28, 4  ;;  %p1114_p0 = pnand %p841_p13, %p1080_p4  ;;  %s1110_s29 = int_to_ptr.vmem [resolvable:$true] %s128_s29 }
  0x16   : > { %s1119_s2 = scalar_lea.sflag [#allocation3], %s114_s22  ;;  %s902_s3 = scalar_lea.hbm %s1108_s27, 512 }
  0x17   : > { %p903_p2 = scmp.ne.s32.totalorder %s1108_s27, %s902_s3  ;;  %p904_p3 = pneg %p1114_p0 }
  0x18   : > { %s907_s12 = scalar_lea.hbm %s1776_s0, 1024  ;;  %p908_p4 = scmp.lt.u32.totalorder %s1108_s27, %s1776_s0 }
  0x19   : > { %p905_p5 = pnand %p904_p3, %p903_p2  ;;  %p909_p7 = scmp.lt.u32.totalorder %s907_s12, %s902_s3 }
  0x1a   : > { %p911_p13 = scmp.lt.u32.totalorder %s902_s3, %s1108_s27 }
  0x1b   : > { %p906_p6 = pneg %p905_p5  ;;  %p910_p10 = por %p909_p7, %p908_p4 }
  0x1d   : > { %p912_p12 = por %p911_p13, %p910_p10 }
  0x1f   : > { %p913_p1 = pnand %p912_p12, %p906_p6 }
  0x21   : > { %916 = shalt.err (!%p913_p1)
}
  0x22   : > { %s917_s16 = scalar_lea.vmem %s1110_s29, 512  ;;  %s1016_s17 = smov [#allocation2]  }
  0x23   : > { %p918_p2 = scmp.ne.s32.totalorder %s1110_s29, %s917_s16  ;;  %s922_s22 = sshll.u32 %s1016_s17, 4  ;;  %s923_s22 = int_to_ptr.vmem [resolvable:$false] %s922_s22 }
  0x24   : > { %s924_s23 = scalar_lea.vmem %s923_s22, 1024  ;;  %p925_p9 = scmp.lt.s32.totalorder %s1110_s29, %s923_s22 }
  0x25   : > { %p920_p5 = pnand %p918_p2, %p904_p3  ;;  %p926_p4 = scmp.lt.s32.totalorder %s924_s23, %s917_s16 }
  0x27   : > { %p921_p11 = pneg %p920_p5  ;;  %p927_p7 = por %p926_p4, %p925_p9 }
  0x29   : > { %p928_p10 = pnand %p927_p7, %p921_p11 }
  0x2b   : > { %931 = shalt.err (!%p928_p10)
}
  0x2c   : > { %s1017_s24 = smov 128   ;;  %s1018_s25 = smov 8  }
  0x2d   : > { %836 = dma.hbm_to_vmem [thread:$0]  (!%p1114_p0), %s1108_s27, 512, %s1110_s29, %s1119_s2, %s1017_s24, %s1017_s24, %s1018_s25  }
  0x2e   : > { %p136_p12 = scmp.lt.s32.totalorder %s1014_s11, 3  ;;  %p1784_p1 = scmp.ge.s32.totalorder %s1014_s11, 1 }
  0x30   : > { %p137_p3 = pnand %p1784_p1, %p136_p12 }
  0x31   : > { %s1151_s26 = sand.u32 (!%p137_p3), 1, %s998_s7  }
  0x32   : > { %140 = sbr.rel (%p137_p3) target bundleno = 718 (0x2ce), region = 24  ;;  %s808_s28 = sshll.u32 (!%p137_p3), %s1151_s26, 5 }
  0x33   : > { %s143_s3 = scalar_lea.sflag (!%p137_p3), [#allocation3], %s1151_s26  ;;  %s146_s4 = scalar_lea.vmem (!%p137_p3), [#allocation2], %s808_s28 }
  0x39   : > { %985 = dma.done.wait (%p1086_p8), %s143_s3, 512  }
  0x3a   : > { %987 = vsyncadd (%p1086_p8), %s143_s3, 4294966784  ;;  %v167_v0 = vld [vmem:[%s146_s4] sm:$0xff]  ;;  %v169_v1 = vld [vmem:[%s146_s4 + $0x10] sm:$0xff]  ;;  %s1019_s27 = smov 112   ;;  %s1020_s29 = smov 127   ;;  %vm231_vm0 = vcmask 121856   ;;  %v195_v34 = vlaneseq }
  0x3b   : > { %175 = vrot.lane.b32.xlu0 %v167_v0, %s1019_s27  ;;  %179 = vrot.lane.b32.xlu1 %v169_v1, %s1019_s27  ;;  %v168_v2 = vld [vmem:[%s146_s4 + $0x8] sm:$0xff]  ;;  %v170_v3 = vld [vmem:[%s146_s4 + $0x18] sm:$0xff]  ;;  %s1021_s18 = smov 15   ;;  %s1022_s30 = smov 126   ;;  %vm268_vm2 = vcmask 113664   ;;  %vm305_vm4 = vcmask 97280  }
  0x3c   : > { %v1250_v39 = vand.u32 127, %v195_v34  ;;  %s1023_s2 = smov 14   ;;  %s1024_s5 = smov 124   ;;  %vm670_vm6 = vcmask 64512  }
  0x3d   : > { %s1025_s12 = smov 12   ;;  %s809_s13 = sshll.u32 %s1151_s26, 7 }
  0x3e   : > { %v197_v42 = vand.u32 1, %v1250_v39  ;;  %s1639_s15 = scalar_lea.vmem [#allocation5], %s809_s13  ;;  %s828_s16 = sshll.u32 %s1006_s9, 11 }
  0x3f   : > { %177 = vrot.lane.b32.xlu0 %v168_v2, %s1019_s27  ;;  %181 = vrot.lane.b32.xlu1 %v170_v3, %s1019_s27  ;;  %s708_s17 = sshll.u32 %s1639_s15, 4  ;;  %s1721_s23 = scalar_lea.hbm %s1777_s1, %s828_s16  ;;  %s1723_s17 = int_to_ptr.vmem [resolvable:$true] %s708_s17 }
  0x40   : > { %vm1264_vm1 = vcmp.ne.s32.totalorder %v197_v42, 0  ;;  %s691_s24 = scalar_lea.sflag [#allocation4], %s1151_s26  ;;  %s932_s25 = scalar_lea.vmem %s1723_s17, 2048 }
  0x41   : > { %p933_p8 = scmp.ne.s32.totalorder %s1723_s17, %s932_s25  ;;  %p1791_p9 = scmp.ne.s32.totalorder %s1781_s19, 0 }
  0x42   : > { %s1026_s28 = smov [#allocation5]  }
  0x43   : > { %p934_p11 = pnand %p933_p8, %p1791_p9  ;;  %s936_s3 = sshll.u32 %s1026_s28, 4  ;;  %s937_s3 = int_to_ptr.vmem [resolvable:$false] %s936_s3 }
  0x44   : > { %s938_s4 = scalar_lea.vmem %s937_s3, 4096  ;;  %p939_p6 = scmp.lt.s32.totalorder %s1723_s17, %s937_s3 }
  0x45   : > { %p935_p0 = pneg %p934_p11  ;;  %p940_p13 = scmp.lt.s32.totalorder %s938_s4, %s932_s25 }
  0x47   : > { %p941_p2 = por %p940_p13, %p939_p6 }
  0x49   : > { %p942_p5 = pnand %p941_p2, %p935_p0 }
  0xad   : > { %v176_v4 = vpop.permute.xlu0 %175  ;;  %v180_v5 = vpop.permute.xlu1 %179 }
  0xae   : > { %v1159_v6 = vadd.f32 %v176_v4, %v167_v0  ;;  %v1163_v7 = vadd.f32 %v180_v5, %v169_v1  ;;  %v1181_v12 = vsub.f32 %v167_v0, %v176_v4  ;;  %v1187_v13 = vsub.f32 %v169_v1, %v180_v5 }
  0xb0   : > { %207 = vrot.lane.b32.xlu0 %v1159_v6, %s1020_s29 }
  0xb1   : > { %v178_v8 = vpop.permute.xlu0 %177  ;;  %v182_v9 = vpop.permute.xlu1 %181 }
  0xb2   : > { %v1165_v10 = vadd.f32 %v178_v8, %v168_v2  ;;  %v1171_v11 = vadd.f32 %v182_v9, %v170_v3  ;;  %v1189_v14 = vsub.f32 %v168_v2, %v178_v8  ;;  %v1195_v15 = vsub.f32 %v170_v3, %v182_v9 }
  0xb4   : > { %211 = vrot.lane.b32.xlu0 %v1163_v7, %s1020_s29  ;;  %209 = vrot.lane.b32.xlu1 %v1165_v10, %s1020_s29 }
  0xb8   : > { %219 = vrot.lane.b32.xlu0 %v1159_v6, %s1021_s18  ;;  %213 = vrot.lane.b32.xlu1 %v1171_v11, %s1020_s29 }
  0xbc   : > { %223 = vrot.lane.b32.xlu0 %v1163_v7, %s1021_s18  ;;  %221 = vrot.lane.b32.xlu1 %v1165_v10, %s1021_s18 }
  0xc0   : > { %426 = vrot.lane.b32.xlu0 %v1181_v12, %s1020_s29  ;;  %225 = vrot.lane.b32.xlu1 %v1171_v11, %s1021_s18 }
  0xc4   : > { %430 = vrot.lane.b32.xlu0 %v1187_v13, %s1020_s29  ;;  %428 = vrot.lane.b32.xlu1 %v1189_v14, %s1020_s29 }
  0xc8   : > { %438 = vrot.lane.b32.xlu0 %v1181_v12, %s1021_s18  ;;  %432 = vrot.lane.b32.xlu1 %v1195_v15, %s1020_s29 }
  0xcc   : > { %442 = vrot.lane.b32.xlu0 %v1187_v13, %s1021_s18  ;;  %440 = vrot.lane.b32.xlu1 %v1189_v14, %s1021_s18 }
  0xd0   : > { %444 = vrot.lane.b32.xlu1 %v1195_v15, %s1021_s18 }
 0x122   : > { %v208_v16 = vpop.permute.xlu0 %207 }
 0x126   : > { %v210_v17 = vpop.permute.xlu1 %209  ;;  %v212_v18 = vpop.permute.xlu0 %211 }
 0x12a   : > { %v214_v19 = vpop.permute.xlu1 %213  ;;  %v220_v20 = vpop.permute.xlu0 %219 }
 0x12b   : > { %v1208_v21 = vsel %vm231_vm0, %v208_v16, %v220_v20 }
 0x12c   : > { %318 = vrot.lane.b32.xlu0 %v1208_v21, %s1020_s29  ;;  %v1272_v44 = vsel %vm1264_vm1, %v1208_v21, %v1159_v6 }
 0x12e   : > { %v222_v22 = vpop.permute.xlu1 %221  ;;  %v224_v23 = vpop.permute.xlu0 %223 }
 0x12f   : > { %v1213_v24 = vsel %vm231_vm0, %v210_v17, %v222_v22  ;;  %v1216_v25 = vsel %vm231_vm0, %v212_v18, %v224_v23 }
 0x130   : > { %320 = vrot.lane.b32.xlu1 %v1213_v24, %s1020_s29  ;;  %322 = vrot.lane.b32.xlu0 %v1216_v25, %s1020_s29  ;;  %v1282_v45 = vsel %vm1264_vm1, %v1213_v24, %v1165_v10  ;;  %v1288_v46 = vsel %vm1264_vm1, %v1216_v25, %v1163_v7 }
 0x132   : > { %v226_v26 = vpop.permute.xlu1 %225  ;;  %v427_v27 = vpop.permute.xlu0 %426 }
 0x133   : > { %v1223_v28 = vsel %vm231_vm0, %v214_v19, %v226_v26 }
 0x134   : > { %324 = vrot.lane.b32.xlu1 %v1223_v28, %s1020_s29  ;;  %330 = vrot.lane.b32.xlu0 %v1208_v21, %s1021_s18  ;;  %v1298_v47 = vsel %vm1264_vm1, %v1223_v28, %v1171_v11 }
 0x136   : > { %v429_v29 = vpop.permute.xlu1 %428  ;;  %v431_v30 = vpop.permute.xlu0 %430 }
 0x138   : > { %332 = vrot.lane.b32.xlu1 %v1213_v24, %s1021_s18  ;;  %334 = vrot.lane.b32.xlu0 %v1216_v25, %s1021_s18 }
 0x13a   : > { %v433_v31 = vpop.permute.xlu1 %432  ;;  %v439_v32 = vpop.permute.xlu0 %438 }
 0x13b   : > { %v1234_v33 = vsel %vm231_vm0, %v427_v27, %v439_v32 }
 0x13c   : > { %336 = vrot.lane.b32.xlu1 %v1223_v28, %s1021_s18  ;;  %534 = vrot.lane.b32.xlu0 %v1234_v33, %s1020_s29  ;;  %v1312_v48 = vsel %vm1264_vm1, %v1234_v33, %v1181_v12 }
 0x13e   : > { %v441_v35 = vpop.permute.xlu1 %440  ;;  %v443_v36 = vpop.permute.xlu0 %442 }
 0x13f   : > { %v1241_v37 = vsel %vm231_vm0, %v429_v29, %v441_v35  ;;  %v1244_v38 = vsel %vm231_vm0, %v431_v30, %v443_v36 }
 0x140   : > { %536 = vrot.lane.b32.xlu1 %v1241_v37, %s1020_s29  ;;  %538 = vrot.lane.b32.xlu0 %v1244_v38, %s1020_s29  ;;  %v1322_v49 = vsel %vm1264_vm1, %v1241_v37, %v1189_v14  ;;  %v1328_v50 = vsel %vm1264_vm1, %v1244_v38, %v1187_v13 }
 0x142   : > { %v445_v40 = vpop.permute.xlu1 %444 }
 0x143   : > { %v1253_v41 = vsel %vm231_vm0, %v433_v31, %v445_v40 }
 0x144   : > { %540 = vrot.lane.b32.xlu1 %v1253_v41, %s1020_s29  ;;  %546 = vrot.lane.b32.xlu0 %v1234_v33, %s1021_s18  ;;  %v1338_v51 = vsel %vm1264_vm1, %v1253_v41, %v1195_v15 }
 0x148   : > { %548 = vrot.lane.b32.xlu1 %v1241_v37, %s1021_s18  ;;  %550 = vrot.lane.b32.xlu0 %v1244_v38, %s1021_s18 }
 0x14c   : > { %552 = vrot.lane.b32.xlu1 %v1253_v41, %s1021_s18  ;;  %244 = vrot.lane.b32.xlu0 %v1272_v44, %s1022_s30 }
 0x150   : > { %246 = vrot.lane.b32.xlu1 %v1282_v45, %s1022_s30  ;;  %248 = vrot.lane.b32.xlu0 %v1288_v46, %s1022_s30 }
 0x154   : > { %250 = vrot.lane.b32.xlu1 %v1298_v47, %s1022_s30  ;;  %256 = vrot.lane.b32.xlu0 %v1272_v44, %s1023_s2 }
 0x158   : > { %258 = vrot.lane.b32.xlu1 %v1282_v45, %s1023_s2  ;;  %260 = vrot.lane.b32.xlu0 %v1288_v46, %s1023_s2 }
 0x15c   : > { %262 = vrot.lane.b32.xlu1 %v1298_v47, %s1023_s2  ;;  %462 = vrot.lane.b32.xlu0 %v1312_v48, %s1022_s30 }
 0x160   : > { %464 = vrot.lane.b32.xlu1 %v1322_v49, %s1022_s30  ;;  %466 = vrot.lane.b32.xlu0 %v1328_v50, %s1022_s30 }
 0x164   : > { %468 = vrot.lane.b32.xlu1 %v1338_v51, %s1022_s30  ;;  %474 = vrot.lane.b32.xlu0 %v1312_v48, %s1023_s2 }
 0x168   : > { %476 = vrot.lane.b32.xlu1 %v1322_v49, %s1023_s2  ;;  %478 = vrot.lane.b32.xlu0 %v1328_v50, %s1023_s2 }
 0x16c   : > { %480 = vrot.lane.b32.xlu1 %v1338_v51, %s1023_s2 }
 0x19e   : > { %v319_v52 = vpop.permute.xlu0 %318 }
 0x1a2   : > { %v321_v53 = vpop.permute.xlu1 %320  ;;  %v323_v54 = vpop.permute.xlu0 %322 }
 0x1a6   : > { %v325_v55 = vpop.permute.xlu1 %324  ;;  %v331_v56 = vpop.permute.xlu0 %330 }
 0x1a7   : > { %v342_v57 = vsel %vm231_vm0, %v319_v52, %v331_v56 }
 0x1a8   : > { %v1354_v58 = vsel %vm1264_vm1, %v342_v57, %v1208_v21  ;;  %v199_v21 = vand.u32 2, %v1250_v39 }
 0x1a9   : > { %354 = vrot.lane.b32.xlu0 %v1354_v58, %s1022_s30 }
 0x1aa   : > { %v333_v59 = vpop.permute.xlu1 %332  ;;  %v335_v60 = vpop.permute.xlu0 %334  ;;  %vm1429_vm3 = vcmp.ne.s32.totalorder %v199_v21, 0 }
 0x1ab   : > { %v343_v61 = vsel %vm231_vm0, %v321_v53, %v333_v59  ;;  %v344_v62 = vsel %vm231_vm0, %v323_v54, %v335_v60 }
 0x1ac   : > { %v1363_v63 = vsel %vm1264_vm1, %v343_v61, %v1213_v24  ;;  %v1368_v0 = vsel %vm1264_vm1, %v344_v62, %v1216_v25 }
 0x1ad   : > { %356 = vrot.lane.b32.xlu1 %v1363_v63, %s1022_s30  ;;  %358 = vrot.lane.b32.xlu0 %v1368_v0, %s1022_s30 }
 0x1ae   : > { %v337_v1 = vpop.permute.xlu1 %336  ;;  %v535_v2 = vpop.permute.xlu0 %534 }
 0x1af   : > { %v345_v3 = vsel %vm231_vm0, %v325_v55, %v337_v1 }
 0x1b0   : > { %v1378_v4 = vsel %vm1264_vm1, %v345_v3, %v1223_v28 }
 0x1b1   : > { %360 = vrot.lane.b32.xlu1 %v1378_v4, %s1022_s30  ;;  %366 = vrot.lane.b32.xlu0 %v1354_v58, %s1023_s2 }
 0x1b2   : > { %v537_v5 = vpop.permute.xlu1 %536  ;;  %v539_v6 = vpop.permute.xlu0 %538 }
 0x1b5   : > { %368 = vrot.lane.b32.xlu1 %v1363_v63, %s1023_s2  ;;  %370 = vrot.lane.b32.xlu0 %v1368_v0, %s1023_s2 }
 0x1b6   : > { %v541_v7 = vpop.permute.xlu1 %540  ;;  %v547_v8 = vpop.permute.xlu0 %546 }
 0x1b7   : > { %v558_v9 = vsel %vm231_vm0, %v535_v2, %v547_v8 }
 0x1b8   : > { %v1392_v10 = vsel %vm1264_vm1, %v558_v9, %v1234_v33 }
 0x1b9   : > { %372 = vrot.lane.b32.xlu1 %v1378_v4, %s1023_s2  ;;  %570 = vrot.lane.b32.xlu0 %v1392_v10, %s1022_s30 }
 0x1ba   : > { %v549_v11 = vpop.permute.xlu1 %548  ;;  %v551_v12 = vpop.permute.xlu0 %550 }
 0x1bb   : > { %v559_v13 = vsel %vm231_vm0, %v537_v5, %v549_v11  ;;  %v560_v14 = vsel %vm231_vm0, %v539_v6, %v551_v12 }
 0x1bc   : > { %v1403_v15 = vsel %vm1264_vm1, %v559_v13, %v1241_v37  ;;  %v1408_v16 = vsel %vm1264_vm1, %v560_v14, %v1244_v38 }
 0x1bd   : > { %572 = vrot.lane.b32.xlu1 %v1403_v15, %s1022_s30  ;;  %574 = vrot.lane.b32.xlu0 %v1408_v16, %s1022_s30 }
 0x1be   : > { %v553_v17 = vpop.permute.xlu1 %552  ;;  %v245_v18 = vpop.permute.xlu0 %244 }
 0x1bf   : > { %v561_v19 = vsel %vm231_vm0, %v541_v7, %v553_v17 }
 0x1c0   : > { %v1418_v20 = vsel %vm1264_vm1, %v561_v19, %v1253_v41 }
 0x1c1   : > { %576 = vrot.lane.b32.xlu1 %v1418_v20, %s1022_s30  ;;  %582 = vrot.lane.b32.xlu0 %v1392_v10, %s1023_s2 }
 0x1c2   : > { %v247_v22 = vpop.permute.xlu1 %246  ;;  %v249_v23 = vpop.permute.xlu0 %248 }
 0x1c5   : > { %584 = vrot.lane.b32.xlu1 %v1403_v15, %s1023_s2  ;;  %586 = vrot.lane.b32.xlu0 %v1408_v16, %s1023_s2 }
 0x1c6   : > { %v251_v25 = vpop.permute.xlu1 %250  ;;  %v257_v26 = vpop.permute.xlu0 %256 }
 0x1c7   : > { %v269_v27 = vsel %vm268_vm2, %v245_v18, %v257_v26 }
 0x1c8   : > { %v1437_v28 = vsel %vm1429_vm3, %v269_v27, %v1272_v44 }
 0x1c9   : > { %588 = vrot.lane.b32.xlu1 %v1418_v20, %s1023_s2  ;;  %281 = vrot.lane.b32.xlu0 %v1437_v28, %s1024_s5 }
 0x1ca   : > { %v259_v29 = vpop.permute.xlu1 %258  ;;  %v261_v30 = vpop.permute.xlu0 %260 }
 0x1cb   : > { %v270_v31 = vsel %vm268_vm2, %v247_v22, %v259_v29  ;;  %v271_v32 = vsel %vm268_vm2, %v249_v23, %v261_v30 }
 0x1cc   : > { %v1448_v33 = vsel %vm1429_vm3, %v270_v31, %v1282_v45  ;;  %v1453_v34 = vsel %vm1429_vm3, %v271_v32, %v1288_v46 }
 0x1cd   : > { %283 = vrot.lane.b32.xlu1 %v1448_v33, %s1024_s5  ;;  %285 = vrot.lane.b32.xlu0 %v1453_v34, %s1024_s5 }
 0x1ce   : > { %v263_v35 = vpop.permute.xlu1 %262  ;;  %v463_v36 = vpop.permute.xlu0 %462 }
 0x1cf   : > { %v272_v37 = vsel %vm268_vm2, %v251_v25, %v263_v35 }
 0x1d0   : > { %v1463_v38 = vsel %vm1429_vm3, %v272_v37, %v1298_v47 }
 0x1d1   : > { %287 = vrot.lane.b32.xlu1 %v1463_v38, %s1024_s5  ;;  %293 = vrot.lane.b32.xlu0 %v1437_v28, %s1025_s12 }
 0x1d2   : > { %v465_v40 = vpop.permute.xlu1 %464  ;;  %v467_v41 = vpop.permute.xlu0 %466 }
 0x1d5   : > { %295 = vrot.lane.b32.xlu1 %v1448_v33, %s1025_s12  ;;  %297 = vrot.lane.b32.xlu0 %v1453_v34, %s1025_s12 }
 0x1d6   : > { %v469_v42 = vpop.permute.xlu1 %468  ;;  %v475_v43 = vpop.permute.xlu0 %474 }
 0x1d7   : > { %v486_v44 = vsel %vm268_vm2, %v463_v36, %v475_v43 }
 0x1d8   : > { %v1477_v45 = vsel %vm1429_vm3, %v486_v44, %v1312_v48 }
 0x1d9   : > { %299 = vrot.lane.b32.xlu1 %v1463_v38, %s1025_s12  ;;  %498 = vrot.lane.b32.xlu0 %v1477_v45, %s1024_s5 }
 0x1da   : > { %v477_v46 = vpop.permute.xlu1 %476  ;;  %v479_v47 = vpop.permute.xlu0 %478 }
 0x1db   : > { %v487_v52 = vsel %vm268_vm2, %v465_v40, %v477_v46  ;;  %v488_v53 = vsel %vm268_vm2, %v467_v41, %v479_v47  ;;  %v201_v46 = vand.u32 4, %v1250_v39 }
 0x1dc   : > { %v1488_v54 = vsel %vm1429_vm3, %v487_v52, %v1322_v49  ;;  %v1493_v48 = vsel %vm1429_vm3, %v488_v53, %v1328_v50 }
 0x1dd   : > { %500 = vrot.lane.b32.xlu1 %v1488_v54, %s1024_s5  ;;  %502 = vrot.lane.b32.xlu0 %v1493_v48, %s1024_s5  ;;  %vm1610_vm5 = vcmp.ne.s32.totalorder %v201_v46, 0 }
 0x1de   : > { %v481_v55 = vpop.permute.xlu1 %480 }
 0x1df   : > { %v489_v56 = vsel %vm268_vm2, %v469_v42, %v481_v55 }
 0x1e0   : > { %v1503_v57 = vsel %vm1429_vm3, %v489_v56, %v1338_v51 }
 0x1e1   : > { %504 = vrot.lane.b32.xlu1 %v1503_v57, %s1024_s5  ;;  %510 = vrot.lane.b32.xlu0 %v1477_v45, %s1025_s12 }
 0x1e5   : > { %512 = vrot.lane.b32.xlu1 %v1488_v54, %s1025_s12  ;;  %514 = vrot.lane.b32.xlu0 %v1493_v48, %s1025_s12 }
 0x1e9   : > { %516 = vrot.lane.b32.xlu1 %v1503_v57, %s1025_s12 }
 0x21b   : > { %v355_v49 = vpop.permute.xlu0 %354 }
 0x21f   : > { %v357_v50 = vpop.permute.xlu1 %356  ;;  %v359_v59 = vpop.permute.xlu0 %358 }
 0x223   : > { %v361_v51 = vpop.permute.xlu1 %360  ;;  %v367_v60 = vpop.permute.xlu0 %366 }
 0x224   : > { %v378_v61 = vsel %vm268_vm2, %v355_v49, %v367_v60 }
 0x225   : > { %v1519_v62 = vsel %vm1429_vm3, %v378_v61, %v1354_v58 }
 0x226   : > { %390 = vrot.lane.b32.xlu0 %v1519_v62, %s1024_s5 }
 0x227   : > { %v369_v1 = vpop.permute.xlu1 %368  ;;  %v371_v2 = vpop.permute.xlu0 %370 }
 0x228   : > { %v379_v3 = vsel %vm268_vm2, %v357_v50, %v369_v1  ;;  %v380_v5 = vsel %vm268_vm2, %v359_v59, %v371_v2 }
 0x229   : > { %v1528_v6 = vsel %vm1429_vm3, %v379_v3, %v1363_v63  ;;  %v1533_v7 = vsel %vm1429_vm3, %v380_v5, %v1368_v0 }
 0x22a   : > { %392 = vrot.lane.b32.xlu1 %v1528_v6, %s1024_s5  ;;  %394 = vrot.lane.b32.xlu0 %v1533_v7, %s1024_s5 }
 0x22b   : > { %v373_v58 = vpop.permute.xlu1 %372  ;;  %v571_v8 = vpop.permute.xlu0 %570 }
 0x22c   : > { %v381_v9 = vsel %vm268_vm2, %v361_v51, %v373_v58 }
 0x22d   : > { %v1543_v63 = vsel %vm1429_vm3, %v381_v9, %v1378_v4 }
 0x22e   : > { %396 = vrot.lane.b32.xlu1 %v1543_v63, %s1024_s5  ;;  %402 = vrot.lane.b32.xlu0 %v1519_v62, %s1025_s12 }
 0x22f   : > { %v573_v0 = vpop.permute.xlu1 %572  ;;  %v575_v11 = vpop.permute.xlu0 %574 }
 0x232   : > { %404 = vrot.lane.b32.xlu1 %v1528_v6, %s1025_s12  ;;  %406 = vrot.lane.b32.xlu0 %v1533_v7, %s1025_s12 }
 0x233   : > { %v577_v12 = vpop.permute.xlu1 %576  ;;  %v583_v13 = vpop.permute.xlu0 %582 }
 0x234   : > { %v594_v14 = vsel %vm268_vm2, %v571_v8, %v583_v13 }
 0x235   : > { %v1557_v4 = vsel %vm1429_vm3, %v594_v14, %v1392_v10 }
 0x236   : > { %408 = vrot.lane.b32.xlu1 %v1543_v63, %s1025_s12  ;;  %606 = vrot.lane.b32.xlu0 %v1557_v4, %s1024_s5 }
 0x237   : > { %v585_v17 = vpop.permute.xlu1 %584  ;;  %v587_v18 = vpop.permute.xlu0 %586 }
 0x238   : > { %v595_v19 = vsel %vm268_vm2, %v573_v0, %v585_v17  ;;  %v596_v21 = vsel %vm268_vm2, %v575_v11, %v587_v18 }
 0x239   : > { %v1568_v22 = vsel %vm1429_vm3, %v595_v19, %v1403_v15  ;;  %v1573_v10 = vsel %vm1429_vm3, %v596_v21, %v1408_v16 }
 0x23a   : > { %608 = vrot.lane.b32.xlu1 %v1568_v22, %s1024_s5  ;;  %610 = vrot.lane.b32.xlu0 %v1573_v10, %s1024_s5 }
 0x23b   : > { %v589_v23 = vpop.permute.xlu1 %588  ;;  %v282_v15 = vpop.permute.xlu0 %281 }
 0x23c   : > { %v597_v25 = vsel %vm268_vm2, %v577_v12, %v589_v23 }
 0x23d   : > { %v1583_v26 = vsel %vm1429_vm3, %v597_v25, %v1418_v20 }
 0x23e   : > { %612 = vrot.lane.b32.xlu1 %v1583_v26, %s1024_s5  ;;  %618 = vrot.lane.b32.xlu0 %v1557_v4, %s1025_s12 }
 0x23f   : > { %v284_v16 = vpop.permute.xlu1 %283  ;;  %v286_v24 = vpop.permute.xlu0 %285 }
 0x242   : > { %620 = vrot.lane.b32.xlu1 %v1568_v22, %s1025_s12  ;;  %622 = vrot.lane.b32.xlu0 %v1573_v10, %s1025_s12 }
 0x243   : > { %v288_v20 = vpop.permute.xlu1 %287  ;;  %v294_v27 = vpop.permute.xlu0 %293 }
 0x244   : > { %v306_v55 = vsel %vm305_vm4, %v282_v15, %v294_v27 }
 0x245   : > { %v310_v59 = vsel %vm1610_vm5, %v306_v55, %v1437_v28 }
 0x246   : > { %624 = vrot.lane.b32.xlu1 %v1583_v26, %s1025_s12 }
 0x247   : > { %v296_v29 = vpop.permute.xlu1 %295  ;;  %v298_v30 = vpop.permute.xlu0 %297 }
 0x248   : > { %v307_v51 = vsel %vm305_vm4, %v284_v16, %v296_v29  ;;  %v308_v60 = vsel %vm305_vm4, %v286_v24, %v298_v30 }
 0x249   : > { %v311_v28 = vsel %vm1610_vm5, %v307_v51, %v1448_v33 }
 0x24b   : > { %v300_v31 = vpop.permute.xlu1 %299  ;;  %v1595_v32 = vpop.permute.xlu0 %498 }
 0x24c   : > { %v309_v13 = vsel %vm305_vm4, %v288_v20, %v300_v31 }
 0x24d   : > { %v313_v25 = vsel %vm1610_vm5, %v309_v13, %v1463_v38 }
 0x24f   : > { %v1597_v35 = vpop.permute.xlu1 %500  ;;  %v1599_v36 = vpop.permute.xlu0 %502 }
 0x253   : > { %v1601_v37 = vpop.permute.xlu1 %504  ;;  %v511_v40 = vpop.permute.xlu0 %510 }
 0x254   : > { %v522_v38 = vsel %vm305_vm4, %v1595_v32, %v511_v40 }
 0x257   : > { %v1603_v41 = vpop.permute.xlu1 %512  ;;  %v1605_v42 = vpop.permute.xlu0 %514 }
 0x258   : > { %v523_v32 = vsel %vm305_vm4, %v1597_v35, %v1603_v41  ;;  %v524_v40 = vsel %vm305_vm4, %v1599_v36, %v1605_v42 }
 0x259   : > { %v528_v35 = vsel %vm1610_vm5, %v524_v40, %v1493_v48 }
 0x25b   : > { %v1607_v43 = vpop.permute.xlu1 %516 }
 0x298   : > { %v391_v44 = vpop.permute.xlu0 %390 }
 0x29c   : > { %v393_v47 = vpop.permute.xlu1 %392  ;;  %v395_v52 = vpop.permute.xlu0 %394 }
 0x2a0   : > { %v397_v56 = vpop.permute.xlu1 %396  ;;  %v403_v49 = vpop.permute.xlu0 %402 }
 0x2a1   : > { %v414_v50 = vsel %vm305_vm4, %v391_v44, %v403_v49 }
 0x2a2   : > { %v418_v39 = vsel %vm1610_vm5, %v414_v50, %v1519_v62  ;;  %v312_v62 = vsel %vm1610_vm5, %v308_v60, %v1453_v34 }
 0x2a3   : > { %v638_v61 = vadd.f32 %v418_v39, %v310_v59  ;;  %v646_v1 = vsub.f32 %v310_v59, %v418_v39 }
 0x2a4   : > { %v405_v2 = vpop.permute.xlu1 %404  ;;  %v407_v3 = vpop.permute.xlu0 %406 }
 0x2a5   : > { %v642_v5 = vmul.f32 0.5, %v638_v61  ;;  %v650_v58 = vmul.f32 0.5, %v646_v1  ;;  %v415_v8 = vsel %vm305_vm4, %v393_v47, %v405_v2  ;;  %v416_v9 = vsel %vm305_vm4, %v395_v52, %v407_v3 }
 0x2a6   : > { %v419_v0 = vsel %vm1610_vm5, %v415_v8, %v1528_v6  ;;  %v420_v11 = vsel %vm1610_vm5, %v416_v9, %v1533_v7 }
 0x2a7   : > { %671 = vst.msk [vmem:[%s1639_s15] sm:$0xff] %vm670_vm6, %v642_v5  ;;  %810 = vst.msk [vmem:[%s1639_s15 + $0x8] sm:$0xff] %vm670_vm6, %v650_v58  ;;  %v639_v33 = vadd.f32 %v419_v0, %v311_v28  ;;  %v647_v34 = vsub.f32 %v311_v28, %v419_v0  ;;  %v640_v12 = vadd.f32 %v420_v11, %v312_v62 }
 0x2a8   : > { %v648_v6 = vsub.f32 %v312_v62, %v420_v11  ;;  %v409_v14 = vpop.permute.xlu1 %408  ;;  %v607_v7 = vpop.permute.xlu0 %606 }
 0x2a9   : > { %v643_v17 = vmul.f32 0.5, %v639_v33  ;;  %v651_v18 = vmul.f32 0.5, %v647_v34  ;;  %v644_v19 = vmul.f32 0.5, %v640_v12  ;;  %v417_v23 = vsel %vm305_vm4, %v397_v56, %v409_v14 }
 0x2aa   : > { %v652_v21 = vmul.f32 0.5, %v648_v6  ;;  %v421_v15 = vsel %vm1610_vm5, %v417_v23, %v1543_v63  ;;  %v526_v63 = vsel %vm1610_vm5, %v522_v38, %v1477_v45 }
 0x2ab   : > { %672 = vst.msk [vmem:[%s1639_s15 + $0x20] sm:$0xff] %vm670_vm6, %v643_v17  ;;  %811 = vst.msk [vmem:[%s1639_s15 + $0x28] sm:$0xff] %vm670_vm6, %v651_v18  ;;  %v641_v16 = vadd.f32 %v421_v15, %v313_v25  ;;  %v649_v24 = vsub.f32 %v313_v25, %v421_v15 }
 0x2ac   : > { %673 = vst.msk [vmem:[%s1639_s15 + $0x40] sm:$0xff] %vm670_vm6, %v644_v19  ;;  %812 = vst.msk [vmem:[%s1639_s15 + $0x48] sm:$0xff] %vm670_vm6, %v652_v21  ;;  %v609_v20 = vpop.permute.xlu1 %608  ;;  %v611_v27 = vpop.permute.xlu0 %610 }
 0x2ad   : > { %v645_v29 = vmul.f32 0.5, %v641_v16  ;;  %v653_v30 = vmul.f32 0.5, %v649_v24 }
 0x2af   : > { %674 = vst.msk [vmem:[%s1639_s15 + $0x60] sm:$0xff] %vm670_vm6, %v645_v29  ;;  %813 = vst.msk [vmem:[%s1639_s15 + $0x68] sm:$0xff] %vm670_vm6, %v653_v30 }
 0x2b0   : > { %v613_v31 = vpop.permute.xlu1 %612  ;;  %v619_v44 = vpop.permute.xlu0 %618 }
 0x2b1   : > { %v630_v46 = vsel %vm305_vm4, %v607_v7, %v619_v44 }
 0x2b2   : > { %v634_v47 = vsel %vm1610_vm5, %v630_v46, %v1557_v4  ;;  %v527_v4 = vsel %vm1610_vm5, %v523_v32, %v1488_v54 }
 0x2b3   : > { %v654_v52 = vadd.f32 %v634_v47, %v526_v63  ;;  %v662_v55 = vsub.f32 %v526_v63, %v634_v47 }
 0x2b4   : > { %v621_v56 = vpop.permute.xlu1 %620  ;;  %v623_v49 = vpop.permute.xlu0 %622 }
 0x2b5   : > { %v658_v50 = vmul.f32 0.5, %v654_v52  ;;  %v666_v45 = vmul.f32 0.5, %v662_v55  ;;  %v631_v59 = vsel %vm305_vm4, %v609_v20, %v621_v56  ;;  %v632_v39 = vsel %vm305_vm4, %v611_v27, %v623_v49 }
 0x2b6   : > { %v635_v36 = vsel %vm1610_vm5, %v631_v59, %v1568_v22  ;;  %v636_v41 = vsel %vm1610_vm5, %v632_v39, %v1573_v10  ;;  %v525_v22 = vsel %vm305_vm4, %v1601_v37, %v1607_v43 }
 0x2b7   : > { %814 = vst.msk [vmem:[%s1639_s15 + $0x10] sm:$0xff] %vm670_vm6, %v658_v50  ;;  %818 = vst.msk [vmem:[%s1639_s15 + $0x18] sm:$0xff] %vm670_vm6, %v666_v45  ;;  %v655_v54 = vadd.f32 %v635_v36, %v527_v4  ;;  %v663_v42 = vsub.f32 %v527_v4, %v635_v36  ;;  %v656_v48 = vadd.f32 %v636_v41, %v528_v35 }
 0x2b8   : > { %v664_v51 = vsub.f32 %v528_v35, %v636_v41  ;;  %v625_v60 = vpop.permute.xlu1 %624  ;;  %v529_v5 = vsel %vm1610_vm5, %v525_v22, %v1503_v57 }
 0x2b9   : > { %v659_v61 = vmul.f32 0.5, %v655_v54  ;;  %v667_v1 = vmul.f32 0.5, %v663_v42  ;;  %v660_v10 = vmul.f32 0.5, %v656_v48  ;;  %v633_v3 = vsel %vm305_vm4, %v613_v31, %v625_v60 }
 0x2ba   : > { %v668_v2 = vmul.f32 0.5, %v664_v51  ;;  %v637_v37 = vsel %vm1610_vm5, %v633_v3, %v1583_v26 }
 0x2bb   : > { %815 = vst.msk [vmem:[%s1639_s15 + $0x30] sm:$0xff] %vm670_vm6, %v659_v61  ;;  %819 = vst.msk [vmem:[%s1639_s15 + $0x38] sm:$0xff] %vm670_vm6, %v667_v1  ;;  %v657_v43 = vadd.f32 %v637_v37, %v529_v5  ;;  %v665_v58 = vsub.f32 %v529_v5, %v637_v37 }
 0x2bc   : > { %816 = vst.msk [vmem:[%s1639_s15 + $0x50] sm:$0xff] %vm670_vm6, %v660_v10  ;;  %820 = vst.msk [vmem:[%s1639_s15 + $0x58] sm:$0xff] %vm670_vm6, %v668_v2 }
 0x2bd   : > { %v661_v57 = vmul.f32 0.5, %v657_v43  ;;  %v669_v8 = vmul.f32 0.5, %v665_v58 }
 0x2bf   : > { %817 = vst.msk [vmem:[%s1639_s15 + $0x70] sm:$0xff] %vm670_vm6, %v661_v57  ;;  %821 = vst.msk [vmem:[%s1639_s15 + $0x78] sm:$0xff] %vm670_vm6, %v669_v8 }
 0x2c0   : > { %945 = shalt.err (!%p942_p5)
}
 0x2c1   : > { %s946_s27 = scalar_lea.hbm %s1721_s23, 2048  ;;  %s950_s30 = scalar_lea.hbm %s1777_s1, 4096 }
 0x2c2   : > { %p947_p4 = scmp.ne.s32.totalorder %s1721_s23, %s946_s27  ;;  %p951_p12 = scmp.lt.u32.totalorder %s1721_s23, %s1777_s1 }
 0x2c3   : > { %p952_p1 = scmp.lt.u32.totalorder %s950_s30, %s946_s27  ;;  %p954_p8 = scmp.lt.u32.totalorder %s946_s27, %s1721_s23 }
 0x2c4   : > { %p948_p7 = pnand %p947_p4, %p1791_p9 }
 0x2c5   : > { %p953_p3 = por %p952_p1, %p951_p12 }
 0x2c6   : > { %p949_p10 = pneg %p948_p7 }
 0x2c7   : > { %p955_p11 = por %p954_p8, %p953_p3 }
 0x2c9   : > { %p956_p0 = pnand %p955_p11, %p949_p10 }
 0x2cb   : > { %959 = shalt.err (!%p956_p0)
}
 0x2cc   : > { %s1027_s12 = smov 128   ;;  %s1028_s13 = smov 8  }
 0x2cd   : > { %831 = dma.vmem_to_hbm [thread:$0]  (%p1791_p9), %s1723_s17, 2048, %s1721_s23, %s691_s24, %s1027_s12, %s1027_s12, %s1028_s13  }
 0x2ce PF: > { %s723_s15 = sand.u32 1, %s994_s6   ;;  %p1792_p6 = scmp.ne.s32.totalorder %s1782_s21, 0 }
 0x2cf   : > { %p1793_p13 = scmp.ge.s32.totalorder %s1014_s11, 2  ;;  %s724_s16 = scalar_lea.sflag [#allocation4], %s723_s15 }
 0x2d1   : > { %p838_p2 = pnand %p1793_p13, %p1792_p6 }
 0x2d3   : > { %989 = dma.done.wait (!%p838_p2), %s724_s16, 2048  }
 0x2d4   : > { %991 = vsyncadd (!%p838_p2), %s724_s16, 4294965248  ;;  %s17_s11 = sadd.s32 1, %s1014_s11   ;;  %s1794_s6 = smov %s998_s7 }
 0x2d5   : > { %p14_p5 = scmp.ge.s32.totalorder %s17_s11, 4   ;;  %s1795_s7 = smov %s1002_s8 }
 0x2d6   : > { %s1796_s8 = smov %s1095_s20  ;;  %s1797_s9 = smov %s1010_s10 }
 0x2d7   : > { %s1798_s10 = smov %s1800_s14  ;;  %16 = sbr.rel (!%p14_p5) target bundleno = 6 (0x6), region = 72 }
 0x2de   :  { %729 = vsyncpa [#allocation3], 1 }
 0x2df   :  { %731 = vsyncpa [#allocation3 + $0x1], 1 }
 0x2e0   :  { %732 = vsyncpa [#allocation4], 1 }
 0x2e1   :  { %734 = vsyncpa [#allocation4 + $0x1], 1 }

</bundles_post_ra>
